<compile_context>
chip_gen: v7x
topology: tpu7x:2x2x1
jax: 0.10.0
libtpu: 0.0.40
codegen_flags: <defaults>
</compile_context>

<pallas_src>
import jax
import jax.numpy as jnp
from jax import lax
from jax.experimental import pallas as pl
from jax.experimental.pallas import tpu as pltpu

BN_EPS = 1e-5
LRELU_SLOPE = 0.2
KH = KW = 4
STRIDE = 2
PAD = 1


def _round_up(x, mult):
    return ((x + mult - 1) // mult) * mult


def _conv_stats_kernel(p_ref, w_ref, conv_ref, stats_ref):
    """Phase 1: conv tile matmul -> store bf16 conv tile + accumulate per-channel
    sum (row 0) / sum-of-squares (row 1) into a resident (8, C_pad) stats block."""
    @pl.when(pl.program_id(1) == 0)
    def _():
        stats_ref[...] = jnp.zeros_like(stats_ref)

    conv = jnp.dot(p_ref[...], w_ref[...], preferred_element_type=jnp.float32)
    conv_bf = conv.astype(jnp.bfloat16)
    conv_ref[...] = conv_bf
    # Stats from the bf16-rounded conv so phase 2 normalizes exactly what was measured.
    c32 = conv_bf.astype(jnp.float32)
    stats_ref[0:1, :] += jnp.sum(c32, axis=0, keepdims=True)
    stats_ref[1:2, :] += jnp.sum(c32 * c32, axis=0, keepdims=True)


def _bn_lrelu_kernel(conv_ref, ss_ref, o_ref):
    """Phase 2: elementwise BN folded into one per-channel FMA + LeakyReLU."""
    y = conv_ref[...].astype(jnp.float32) * ss_ref[0:1, :] + ss_ref[1:2, :]
    o_ref[...] = jnp.maximum(y, LRELU_SLOPE * y)


def _im2col_nhwc(x_nhwc, k_pad):
    """NHWC input -> (N*Hout*Wout, k_pad) patches, K ordered (kh, kw, C_in), with the
    zero K-padding built into the concat (no separate pad pass, no big transpose)."""
    n, h, w, c = x_nhwc.shape
    h_out = (h + 2 * PAD - KH) // STRIDE + 1
    w_out = (w + 2 * PAD - KW) // STRIDE + 1
    xp = jnp.pad(x_nhwc, ((0, 0), (PAD, PAD), (PAD, PAD), (0, 0)))
    cols = []
    for i in range(KH):
        for j in range(KW):
            cols.append(xp[:, i:i + STRIDE * h_out:STRIDE,
                              j:j + STRIDE * w_out:STRIDE, :])
    k = KH * KW * c
    if k_pad > k:
        cols.append(jnp.zeros((n, h_out, w_out, k_pad - k), dtype=x_nhwc.dtype))
    patches = jnp.concatenate(cols, axis=-1)
    return patches.reshape(n * h_out * w_out, k_pad), h_out, w_out


def _vmem_budget_bytes():
    """(tile-selection budget, compiler vmem_limit_bytes) per TPU generation."""
    try:
        kind = jax.devices()[0].device_kind.lower()
    except Exception:
        kind = ""
    if "v7" in kind:            # 64 MiB physical VMEM per TensorCore
        return 36 << 20, 48 << 20
    return 56 << 20, 64 << 20   # v5e / v6e: 128 MiB physical


def _pick_tile_m(m, k_pad, c_pad, budget_bytes):
    """Largest M tile (multiple of 16, preferring multiples of 256) under budget."""
    # Resident / constant blocks (double-buffered by the pipeline):
    #   weights bf16 x2, stats f32 (8,C) x2, scale_shift f32 (2,C) x2
    resident = 2 * (k_pad * c_pad * 2) + 2 * (8 * c_pad * 4) + 2 * (2 * c_pad * 4)
    # Per-M-row bytes:
    #   phase 1: patches bf16 x2 bufs + conv out bf16 x2 bufs + ~3x f32 temps (conv, c32, c32^2)
    per_row_p1 = 2 * (k_pad * 2) + 2 * (c_pad * 2) + 3 * (c_pad * 4)
    #   phase 2: conv in bf16 x2 + out f32 x2 + ~2x f32 temps
    per_row_p2 = 2 * (c_pad * 2) + 2 * (c_pad * 4) + 2 * (c_pad * 4)
    per_row = max(per_row_p1, per_row_p2)
    tile = max(16, (budget_bytes - resident) // per_row)
    tile = min(tile, 2048)
    if tile >= 256:
        tile = (tile // 256) * 256   # big tiles: amortize per-step overhead, stay near roofline
    else:
        tile = (tile // 16) * 16     # bf16 sublane packing granularity
    tile = min(tile, _round_up(m, 16))
    return max(16, tile)


@jax.jit
def downblock_forward(x, conv_w, conv_b, bn_gamma, bn_beta):
    """x: (N, C_in, H, W) f32. conv_w: (C_out, C_in, 4, 4). Returns (N, C_out, H/2, W/2) f32."""
    # Train-mode BatchNorm subtracts the per-channel batch mean, which exactly cancels a
    # constant conv bias (and leaves the variance unchanged) -> bias dropped from the kernel.
    del conv_b

    n, c_in, _, _ = x.shape
    c_out = conv_w.shape[0]
    k = c_in * KH * KW

    # Lane-dense padded dims; align channels to 256 for the 256-wide v6e/v7x MXUs when wide.
    c_pad = _round_up(c_out, 256) if c_out > 128 else 128
    k_pad = _round_up(k, 128)
    # TODO(synk): for very wide layers (c_pad >= 512) a channel grid axis over w_mat would keep
    #             the resident weight block small; not needed at these shapes.

    # bf16 MXU operands (f32 accumulation) halve patch HBM traffic.
    x_nhwc = x.astype(jnp.bfloat16).transpose(0, 2, 3, 1)
    patches, h_out, w_out = _im2col_nhwc(x_nhwc, k_pad)
    m = patches.shape[0]

    budget, vmem_limit = _vmem_budget_bytes()
    tile_m = _pick_tile_m(m, k_pad, c_pad, budget)

    tiles = pl.cdiv(m, tile_m)
    n_split = 2 if tiles >= 2 else 1   # share the phase-1 M sweep across 2 TCs (v7x megacore)
    tiles_total = _round_up(tiles, n_split)
    tiles_per_split = tiles_total // n_split
    m_pad = tiles_total * tile_m
    if m_pad > m:
        # Zero rows produce zero conv outputs (no bias) -> stats are unaffected.
        patches = jnp.pad(patches, ((0, m_pad - m), (0, 0)))

    # (C_out, C_in, kh, kw) -> (kh, kw, C_in, C_out) -> (K, C_out), matching the patch K order.
    w_mat = conv_w.transpose(2, 3, 1, 0).reshape(k, c_out).astype(jnp.bfloat16)
    w_mat = jnp.pad(w_mat, ((0, k_pad - k), (0, c_pad - c_out)))

    # ---- Phase 1: conv matmul (stored bf16) + per-channel sum / sum-of-squares ----
    conv_flat, stats = pl.pallas_call(
        _conv_stats_kernel,
        out_shape=(jax.ShapeDtypeStruct((m_pad, c_pad), jnp.bfloat16),
                   jax.ShapeDtypeStruct((n_split * 8, c_pad), jnp.float32)),
        grid=(n_split, tiles_per_split),
        in_specs=[
            pl.BlockSpec((tile_m, k_pad), lambda c, t: (c * tiles_per_split + t, 0)),
            pl.BlockSpec((k_pad, c_pad), lambda c, t: (0, 0)),
        ],
        out_specs=(
            pl.BlockSpec((tile_m, c_pad), lambda c, t: (c * tiles_per_split + t, 0)),
            pl.BlockSpec((8, c_pad), lambda c, t: (c, 0)),
        ),
        compiler_params=pltpu.CompilerParams(
            dimension_semantics=("parallel", "arbitrary"),
            vmem_limit_bytes=vmem_limit),
    )(patches, w_mat)

    # Fold BN into one per-channel FMA (tiny f32 work in the wrapper).
    count = jnp.float32(m)
    s = stats.reshape(n_split, 8, c_pad).sum(axis=0)
    mean = s[0] / count
    # E[x^2] - E[x]^2 in f32 with clamp; adequate alongside the bf16 conv precision.
    var = jnp.maximum(s[1] / count - mean * mean, 0.0)
    inv_std = lax.rsqrt(var + BN_EPS)
    gamma = jnp.pad(bn_gamma.astype(jnp.float32), (0, c_pad - c_out))
    beta = jnp.pad(bn_beta.astype(jnp.float32), (0, c_pad - c_out))
    scale = gamma * inv_std
    shift = beta - mean * scale
    scale_shift = jnp.stack([scale, shift], axis=0)       # single (2, C_pad) constant block

    # ---- Phase 2: elementwise BN + LeakyReLU on the stored conv (no patch re-read) ----
    out_flat = pl.pallas_call(
        _bn_lrelu_kernel,
        out_shape=jax.ShapeDtypeStruct((m_pad, c_pad), jnp.float32),
        grid=(tiles_total,),
        in_specs=[
            pl.BlockSpec((tile_m, c_pad), lambda i: (i, 0)),
            pl.BlockSpec((2, c_pad), lambda i: (0, 0)),
        ],
        out_specs=pl.BlockSpec((tile_m, c_pad), lambda i: (i, 0)),
        compiler_params=pltpu.CompilerParams(
            dimension_semantics=("parallel",),
            vmem_limit_bytes=vmem_limit),
    )(conv_flat, scale_shift)

    # Strip padding, (M, C_out) -> NHWC -> NCHW to match the PyTorch module's output layout.
    out = out_flat[:m, :c_out].reshape(n, h_out, w_out, c_out).transpose(0, 3, 1, 2)
    return out


if __name__ == "__main__":
    key = jax.random.PRNGKey(0)
    k_x, k_w, k_b = jax.random.split(key, 3)

    N, C_IN, H, W = 2, 4, 16, 16
    C_OUT = 8

    x = jax.random.normal(k_x, (N, C_IN, H, W), dtype=jnp.float32)
    conv_w = jax.random.normal(k_w, (C_OUT, C_IN, 4, 4), dtype=jnp.float32) * 0.1
    conv_b = jax.random.normal(k_b, (C_OUT,), dtype=jnp.float32) * 0.1
    # BatchNorm2d default init: weight (gamma) = 1, bias (beta) = 0.
    bn_gamma = jnp.ones((C_OUT,), dtype=jnp.float32)
    bn_beta = jnp.zeros((C_OUT,), dtype=jnp.float32)
    # TODO(synk): spectral_norm is imported but unused in the reference module; not applied here.
    # TODO(synk): BatchNorm2d running_mean/running_var updates are training-state side effects
    #             and are not produced by this forward-only kernel.

    out = downblock_forward(x, conv_w, conv_b, bn_gamma, bn_beta)
    jax.block_until_ready(out)
    assert out.shape == (N, C_OUT, H // 2, W // 2), out.shape

    # Loose-tolerance sanity check vs. a pure-JAX f32 reference (kernel uses bf16 MXU operands).
    def _ref(x, w, b, g, bta):
        y = lax.conv_general_dilated(x, w, (STRIDE, STRIDE), ((PAD, PAD), (PAD, PAD)),
                                     dimension_numbers=("NCHW", "OIHW", "NCHW"))
        y = y + b[None, :, None, None]          # cancelled by BN mean subtraction below
        mean = y.mean(axis=(0, 2, 3), keepdims=True)
        var = y.var(axis=(0, 2, 3), keepdims=True)
        y = (y - mean) * lax.rsqrt(var + BN_EPS) * g[None, :, None, None] + bta[None, :, None, None]
        return jnp.where(y >= 0, y, LRELU_SLOPE * y)

    ref = _ref(x, conv_w, conv_b, bn_gamma, bn_beta)
    max_err = float(jnp.max(jnp.abs(out - ref)))
    assert max_err < 0.25, f"max abs err too large: {max_err}"
    print("KERNEL_OK")
</pallas_src>

<mosaic_0001>
module attributes {stable_mosaic.version = 11 : i64} {
  func.func @_conv_stats_kernel(%arg0: i32, %arg1: i32, %arg2: memref<128x128xbf16, #tpu.memory_space<vmem>>, %arg3: memref<128x128xbf16, #tpu.memory_space<vmem>>, %arg4: memref<128x128xbf16, #tpu.memory_space<vmem>>, %arg5: memref<8x128xf32, #tpu.memory_space<vmem>>) attributes {dimension_semantics = [#tpu.dimension_semantics<parallel>, #tpu.dimension_semantics<arbitrary>], iteration_bounds = array<i64: 1, 1>, scalar_prefetch = 0 : i64, scratch_operands = 0 : i64, tpu.core_type = #tpu.core_type<tc>, window_params = [{transform_indices = @transform_0, window_bounds = array<i64: 128, 128>}, {pipeline_mode = #tpu.pipeline_mode<synchronous>, transform_indices = @transform_1, window_bounds = array<i64: 128, 128>}, {transform_indices = @transform_2, window_bounds = array<i64: 128, 128>}, {transform_indices = @transform_3, window_bounds = array<i64: 8, 128>}]} {
    %c0_i32 = arith.constant 0 : i32
    %0 = arith.cmpi eq, %arg1, %c0_i32 : i32
    %1 = arith.extui %0 : i1 to i32
    %c0_i32_0 = arith.constant 0 : i32
    %2 = arith.cmpi ne, %1, %c0_i32_0 : i32
    scf.if %2 {
      %cst_15 = arith.constant 0.000000e+00 : f32
      %20 = vector.broadcast %cst_15 : f32 to vector<8x128xf32>
      %c0_16 = arith.constant 0 : index
      %c0_17 = arith.constant 0 : index
      %21 = vector.load %arg5[%c0_16, %c0_17] : memref<8x128xf32, #tpu.memory_space<vmem>>, vector<8x128xf32>
      tpu.vector_store %arg5[%c0_16, %c0_17], %20 {strides = array<i32>} : memref<8x128xf32, #tpu.memory_space<vmem>>, vector<8x128xf32>,
    } else {
    }
    %c0 = arith.constant 0 : index
    %c0_1 = arith.constant 0 : index
    %3 = vector.load %arg2[%c0, %c0_1] : memref<128x128xbf16, #tpu.memory_space<vmem>>, vector<128x128xbf16>
    %c0_2 = arith.constant 0 : index
    %c0_3 = arith.constant 0 : index
    %4 = vector.load %arg3[%c0_2, %c0_3] : memref<128x128xbf16, #tpu.memory_space<vmem>>, vector<128x128xbf16>
    %cst = arith.constant dense<0.000000e+00> : vector<128x128xf32>
    %5 = tpu.matmul %3, %4, %cst {dimension_numbers = #tpu.dot_dimension_numbers<[1], [0], [0], [1], [0, 0, 1, 1], [], []>} : vector<128x128xbf16>, vector<128x128xbf16>, vector<128x128xf32> -> vector<128x128xf32>
    %6 = arith.truncf %5 : vector<128x128xf32> to vector<128x128xbf16>
    %c0_4 = arith.constant 0 : index
    %c0_5 = arith.constant 0 : index
    %7 = vector.load %arg4[%c0_4, %c0_5] : memref<128x128xbf16, #tpu.memory_space<vmem>>, vector<128x128xbf16>
    tpu.vector_store %arg4[%c0_4, %c0_5], %6 {strides = array<i32>} : memref<128x128xbf16, #tpu.memory_space<vmem>>, vector<128x128xbf16>,
    %8 = arith.extf %6 : vector<128x128xbf16> to vector<128x128xf32>
    %c0_6 = arith.constant 0 : index
    %c0_7 = arith.constant 0 : index
    %9 = vector.load %arg5[%c0_6, %c0_7] : memref<8x128xf32, #tpu.memory_space<vmem>>, vector<1x128xf32>
    %cst_8 = arith.constant dense<0.000000e+00> : vector<128xf32>
    %10 = vector.multi_reduction <add>, %8, %cst_8 [0] : vector<128x128xf32> to vector<128xf32>
    %11 = vector.shape_cast %10 : vector<128xf32> to vector<1x128xf32>
    %12 = arith.addf %9, %11 : vector<1x128xf32>
    %c0_9 = arith.constant 0 : index
    %c0_10 = arith.constant 0 : index
    %13 = vector.load %arg5[%c0_9, %c0_10] : memref<8x128xf32, #tpu.memory_space<vmem>>, vector<1x128xf32>
    tpu.vector_store %arg5[%c0_9, %c0_10], %12 {strides = array<i32>} : memref<8x128xf32, #tpu.memory_space<vmem>>, vector<1x128xf32>,
    %c1 = arith.constant 1 : index
    %c0_11 = arith.constant 0 : index
    %14 = vector.load %arg5[%c1, %c0_11] : memref<8x128xf32, #tpu.memory_space<vmem>>, vector<1x128xf32>
    %15 = arith.mulf %8, %8 : vector<128x128xf32>
    %cst_12 = arith.constant dense<0.000000e+00> : vector<128xf32>
    %16 = vector.multi_reduction <add>, %15, %cst_12 [0] : vector<128x128xf32> to vector<128xf32>
    %17 = vector.shape_cast %16 : vector<128xf32> to vector<1x128xf32>
    %18 = arith.addf %14, %17 : vector<1x128xf32>
    %c1_13 = arith.constant 1 : index
    %c0_14 = arith.constant 0 : index
    %19 = vector.load %arg5[%c1_13, %c0_14] : memref<8x128xf32, #tpu.memory_space<vmem>>, vector<1x128xf32>
    tpu.vector_store %arg5[%c1_13, %c0_14], %18 {strides = array<i32>} : memref<8x128xf32, #tpu.memory_space<vmem>>, vector<1x128xf32>,
    return
  }
  func.func @transform_0(%arg0: i32, %arg1: i32) -> (i32, i32) {
    %c1_i32 = arith.constant 1 : i32
    %0 = arith.muli %arg0, %c1_i32 : i32
    %1 = arith.addi %0, %arg1 : i32
    %c0_i32 = arith.constant 0 : i32
    %c0_i32_0 = arith.constant 0 : i32
    return %1, %c0_i32 : i32, i32
  }
  func.func @transform_1(%arg0: i32, %arg1: i32) -> (i32, i32) {
    %c0_i32 = arith.constant 0 : i32
    %c0_i32_0 = arith.constant 0 : i32
    %c0_i32_1 = arith.constant 0 : i32
    return %c0_i32, %c0_i32_0 : i32, i32
  }
  func.func @transform_2(%arg0: i32, %arg1: i32) -> (i32, i32) {
    %c1_i32 = arith.constant 1 : i32
    %0 = arith.muli %arg0, %c1_i32 : i32
    %1 = arith.addi %0, %arg1 : i32
    %c0_i32 = arith.constant 0 : i32
    %c0_i32_0 = arith.constant 0 : i32
    return %1, %c0_i32 : i32, i32
  }
  func.func @transform_3(%arg0: i32, %arg1: i32) -> (i32, i32) {
    %c0_i32 = arith.constant 0 : i32
    %c0_i32_0 = arith.constant 0 : i32
    return %arg0, %c0_i32 : i32, i32
  }
}

module attributes {stable_mosaic.version = 11 : i64} {
  func.func @_bn_lrelu_kernel(%arg0: i32, %arg1: memref<128x128xbf16, #tpu.memory_space<vmem>>, %arg2: memref<2x128xf32, #tpu.memory_space<vmem>>, %arg3: memref<128x128xf32, #tpu.memory_space<vmem>>) attributes {dimension_semantics = [#tpu.dimension_semantics<parallel>], iteration_bounds = array<i64: 1>, scalar_prefetch = 0 : i64, scratch_operands = 0 : i64, tpu.core_type = #tpu.core_type<tc>, window_params = [{transform_indices = @transform_0, window_bounds = array<i64: 128, 128>}, {pipeline_mode = #tpu.pipeline_mode<synchronous>, transform_indices = @transform_1, window_bounds = array<i64: 2, 128>}, {transform_indices = @transform_2, window_bounds = array<i64: 128, 128>}]} {
    %c0 = arith.constant 0 : index
    %c0_0 = arith.constant 0 : index
    %0 = vector.load %arg1[%c0, %c0_0] : memref<128x128xbf16, #tpu.memory_space<vmem>>, vector<128x128xbf16>
    %1 = arith.extf %0 : vector<128x128xbf16> to vector<128x128xf32>
    %c0_1 = arith.constant 0 : index
    %c0_2 = arith.constant 0 : index
    %2 = vector.load %arg2[%c0_1, %c0_2] : memref<2x128xf32, #tpu.memory_space<vmem>>, vector<1x128xf32>
    %3 = vector.broadcast %2 : vector<1x128xf32> to vector<128x128xf32>
    %4 = arith.mulf %1, %3 : vector<128x128xf32>
    %c1 = arith.constant 1 : index
    %c0_3 = arith.constant 0 : index
    %5 = vector.load %arg2[%c1, %c0_3] : memref<2x128xf32, #tpu.memory_space<vmem>>, vector<1x128xf32>
    %6 = vector.broadcast %5 : vector<1x128xf32> to vector<128x128xf32>
    %7 = arith.addf %4, %6 : vector<128x128xf32>
    %cst = arith.constant 2.000000e-01 : f32
    %8 = vector.broadcast %cst : f32 to vector<128x128xf32>
    %9 = arith.mulf %8, %7 : vector<128x128xf32>
    %10 = arith.maximumf %7, %9 : vector<128x128xf32>
    %c0_4 = arith.constant 0 : index
    %c0_5 = arith.constant 0 : index
    %11 = vector.load %arg3[%c0_4, %c0_5] : memref<128x128xf32, #tpu.memory_space<vmem>>, vector<128x128xf32>
    tpu.vector_store %arg3[%c0_4, %c0_5], %10 {strides = array<i32>} : memref<128x128xf32, #tpu.memory_space<vmem>>, vector<128x128xf32>,
    return
  }
  func.func @transform_0(%arg0: i32) -> (i32, i32) {
    %c0_i32 = arith.constant 0 : i32
    %c0_i32_0 = arith.constant 0 : i32
    return %arg0, %c0_i32 : i32, i32
  }
  func.func @transform_1(%arg0: i32) -> (i32, i32) {
    %c0_i32 = arith.constant 0 : i32
    %c0_i32_0 = arith.constant 0 : i32
    %c0_i32_1 = arith.constant 0 : i32
    return %c0_i32, %c0_i32_0 : i32, i32
  }
  func.func @transform_2(%arg0: i32) -> (i32, i32) {
    %c0_i32 = arith.constant 0 : i32
    %c0_i32_0 = arith.constant 0 : i32
    return %arg0, %c0_i32 : i32, i32
  }
}

</mosaic_0001>

<bundles_post_ra>
// kernel: downblock_forward.3
= control target key start
LH: loop header
LB: loop body
LE: loop exit
PB: predicated region body
PF: predicated region fallthrough
CT: control target
= control target key end

     0   :  { %7 = vsyncpa [#allocation3], 0  ;;  %s392_s0 = inlined_call_operand.hbm [shape: bf16[128,128], index: 0, kind: input, shape index: {}]   ;;  %s393_s1 = inlined_call_operand.hbm [shape: f32[2,128], index: 1, kind: input, shape index: {}]   ;;  %s394_s2 = inlined_call_operand.hbm [shape: f32[128,128], index: 2, kind: output, shape index: {}]  }
   0x1   :  { %8 = vsyncpa [#allocation6], 0 }
   0x2   :  { %9 = vsyncpa [#allocation4], 0  ;;  %s298_s9 = smov [#allocation2]   ;;  %s226_s13 = scalar_lea.hbm %s392_s0, 1024 }
   0x3   :  { %s15_s10 = sshll.u32 %s298_s9, 4  ;;  %p227_p0 = scmp.ne.s32.totalorder %s392_s0, %s226_s13  ;;  %s16_s10 = int_to_ptr.vmem [resolvable:$true] %s15_s10 }
   0x4   :  { %p230_p1 = scmp.lt.u32.totalorder %s226_s13, %s392_s0 }
   0x6   :  { %p232_p2 = pnand %p230_p1, %p227_p0 }
   0x8   :  { %235 = shalt.err (!%p232_p2)
}
   0x9   :  { %s236_s18 = scalar_lea.vmem %s16_s10, 1024  ;;  %p241_p4 = scmp.lt.s32.totalorder %s16_s10, %s16_s10 }
   0xa   :  { %p237_p3 = scmp.ne.s32.totalorder %s16_s10, %s236_s18  ;;  %p242_p5 = scmp.lt.s32.totalorder %s236_s18, %s236_s18 }
   0xc   :  { %p243_p6 = por %p242_p5, %p241_p4 }
   0xe   :  { %p244_p7 = pnand %p243_p6, %p237_p3 }
  0x10   :  { %247 = shalt.err (!%p244_p7)
}
  0x11   :  { %s299_s19 = smov 64   ;;  %s300_s20 = smov 4  }
  0x12   :  { %21 = dma.hbm_to_vmem [thread:$0]  %s392_s0, 1024, %s16_s10, [#allocation3], %s299_s19, %s299_s19, %s300_s20  }
  0x13   :  { %s301_s23 = smov [#allocation5]   ;;  %s248_s27 = scalar_lea.hbm %s393_s1, 32 }
  0x14   :  { %s28_s24 = sshll.u32 %s301_s23, 4  ;;  %p249_p8 = scmp.ne.s32.totalorder %s393_s1, %s248_s27  ;;  %s29_s24 = int_to_ptr.vmem [resolvable:$true] %s28_s24 }
  0x15   :  { %p252_p9 = scmp.lt.u32.totalorder %s248_s27, %s393_s1 }
  0x17   :  { %p254_p10 = pnand %p252_p9, %p249_p8 }
  0x19   :  { %257 = shalt.err (!%p254_p10)
}
  0x1a   :  { %s258_s4 = scalar_lea.vmem %s29_s24, 32  ;;  %p263_p12 = scmp.lt.s32.totalorder %s29_s24, %s29_s24 }
  0x1b   :  { %p259_p11 = scmp.ne.s32.totalorder %s29_s24, %s258_s4  ;;  %p264_p13 = scmp.lt.s32.totalorder %s258_s4, %s258_s4 }
  0x1d   :  { %p265_p0 = por %p264_p13, %p263_p12 }
  0x1f   :  { %p266_p1 = pnand %p265_p0, %p259_p11 }
  0x21   :  { %269 = shalt.err (!%p266_p1)
}
  0x22   :  { %31 = dma.hbm_to_vmem [thread:$0]  %s393_s1, 32, %s29_s24, [#allocation6]  }
  0x23   :  { %292 = dma.done.wait [#allocation3], 1024  }
  0x24   :  { %293 = vsyncadd [#allocation3], 4294966272 }
  0x25   :  { %294 = dma.done.wait [#allocation6], 32  }
  0x26   :  { %295 = vsyncadd [#allocation6], 4294967264  ;;  %v181_v0 = vld [vmem:[#allocation2] sm:$0xff]   ;;  %v212_v4 = vld [vmem:[#allocation2 + $0x8] sm:$0xff]   ;;  %s302_s1 = smov [#allocation7]  }
  0x27   :  { %v344_v1 = vld [vmem:[#allocation5] ss:$0 sm:$0xff]  ;;  %v182_v2 = vunpack.c.l.bf16 %v181_v0  ;;  %v183_v3 = vunpack.c.h.bf16 %v181_v0  ;;  %v213_v5 = vld [vmem:[#allocation2 + $0x10] sm:$0xff]   ;;  %v214_v6 = vld [vmem:[#allocation2 + $0x18] sm:$0xff]   ;;  %v186_v8 = vunpack.c.l.bf16 %v212_v4  ;;  %v187_v9 = vunpack.c.h.bf16 %v212_v4  ;;  %s165_s6 = sshll.u32 %s302_s1, 4  ;;  %s166_s6 = int_to_ptr.vmem [resolvable:$true] %s165_s6 }
  0x28   :  { %v346_v7 = vld [vmem:[#allocation5 + $0x1] ss:$0 sm:$0xff]  ;;  %v190_v10 = vunpack.c.l.bf16 %v213_v5  ;;  %v191_v11 = vunpack.c.h.bf16 %v213_v5  ;;  %v194_v14 = vunpack.c.l.bf16 %v214_v6  ;;  %v195_v15 = vunpack.c.h.bf16 %v214_v6  ;;  %v216_v41 = vld [vmem:[#allocation2 + $0x28] sm:$0xff]   ;;  %v217_v42 = vld [vmem:[#allocation2 + $0x30] sm:$0xff]   ;;  %s270_s7 = scalar_lea.vmem %s166_s6, 2048  ;;  %p275_p3 = scmp.lt.s32.totalorder %s166_s6, %s166_s6 }
  0x29   :  { %v75_v12 = vmul.f32 %v182_v2, %v344_v1  ;;  %v76_v13 = vmul.f32 %v183_v3, %v344_v1  ;;  %v77_v16 = vmul.f32 %v186_v8, %v344_v1  ;;  %v78_v17 = vmul.f32 %v187_v9, %v344_v1  ;;  %v215_v24 = vld [vmem:[#allocation2 + $0x20] sm:$0xff]   ;;  %v218_v47 = vld [vmem:[#allocation2 + $0x38] sm:$0xff]   ;;  %p271_p2 = scmp.ne.s32.totalorder %s166_s6, %s270_s7  ;;  %p276_p4 = scmp.lt.s32.totalorder %s270_s7, %s270_s7 }
  0x2a   :  { %v79_v18 = vmul.f32 %v190_v10, %v344_v1  ;;  %v80_v19 = vmul.f32 %v191_v11, %v344_v1  ;;  %v81_v22 = vmul.f32 %v194_v14, %v344_v1  ;;  %v82_v23 = vmul.f32 %v195_v15, %v344_v1 }
  0x2b   :  { %v96_v20 = vadd.f32 %v346_v7, %v75_v12  ;;  %v97_v21 = vadd.f32 %v346_v7, %v76_v13  ;;  %v98_v25 = vadd.f32 %v346_v7, %v77_v16  ;;  %v99_v26 = vadd.f32 %v346_v7, %v78_v17  ;;  %p277_p5 = por %p276_p4, %p275_p3 }
  0x2c   :  { %v100_v27 = vadd.f32 %v346_v7, %v79_v18  ;;  %v101_v28 = vadd.f32 %v346_v7, %v80_v19  ;;  %v102_v31 = vadd.f32 %v346_v7, %v81_v22  ;;  %v103_v32 = vadd.f32 %v346_v7, %v82_v23 }
  0x2d   :  { %v112_v29 = vmul.f32 0.2, %v96_v20  ;;  %v113_v30 = vmul.f32 0.2, %v97_v21  ;;  %v114_v33 = vmul.f32 0.2, %v98_v25  ;;  %v198_v36 = vunpack.c.l.bf16 %v215_v24  ;;  %p278_p6 = pnand %p277_p5, %p271_p2 }
  0x2e   :  { %v115_v34 = vmul.f32 0.2, %v99_v26  ;;  %v116_v35 = vmul.f32 0.2, %v100_v27  ;;  %v117_v39 = vmul.f32 0.2, %v101_v28  ;;  %v199_v51 = vunpack.c.h.bf16 %v215_v24 }
  0x2f   :  { %v128_v37 = vmax.f32 %v96_v20, %v112_v29  ;;  %v129_v38 = vmax.f32 %v97_v21, %v113_v30  ;;  %v118_v40 = vmul.f32 0.2, %v102_v31  ;;  %v130_v43 = vmax.f32 %v98_v25, %v114_v33 }
  0x30   :  { %v131_v44 = vmax.f32 %v99_v26, %v115_v34  ;;  %v132_v45 = vmax.f32 %v100_v27, %v116_v35  ;;  %v119_v46 = vmul.f32 0.2, %v103_v32  ;;  %v133_v48 = vmax.f32 %v101_v28, %v117_v39 }
  0x31   :  { %144 = vst [vmem:[#allocation7] sm:$0xff] %v128_v37  ;;  %145 = vst [vmem:[#allocation7 + $0x8] sm:$0xff] %v129_v38  ;;  %v134_v49 = vmax.f32 %v102_v31, %v118_v40  ;;  %v83_v50 = vmul.f32 %v198_v36, %v344_v1  ;;  %v202_v53 = vunpack.c.l.bf16 %v216_v41  ;;  %v203_v54 = vunpack.c.h.bf16 %v216_v41 }
  0x32   :  { %146 = vst [vmem:[#allocation7 + $0x10] sm:$0xff] %v130_v43  ;;  %147 = vst [vmem:[#allocation7 + $0x18] sm:$0xff] %v131_v44  ;;  %v135_v52 = vmax.f32 %v103_v32, %v119_v46  ;;  %v206_v55 = vunpack.c.l.bf16 %v217_v42  ;;  %v84_v57 = vmul.f32 %v199_v51, %v344_v1  ;;  %v207_v58 = vunpack.c.h.bf16 %v217_v42 }
  0x33   :  { %148 = vst [vmem:[#allocation7 + $0x20] sm:$0xff] %v132_v45  ;;  %149 = vst [vmem:[#allocation7 + $0x28] sm:$0xff] %v133_v48  ;;  %v104_v56 = vadd.f32 %v346_v7, %v83_v50  ;;  %v210_v59 = vunpack.c.l.bf16 %v218_v47  ;;  %v85_v60 = vmul.f32 %v202_v53, %v344_v1  ;;  %v86_v61 = vmul.f32 %v203_v54, %v344_v1 }
  0x34   :  { %150 = vst [vmem:[#allocation7 + $0x30] sm:$0xff] %v134_v49  ;;  %151 = vst [vmem:[#allocation7 + $0x38] sm:$0xff] %v135_v52  ;;  %v87_v62 = vmul.f32 %v206_v55, %v344_v1  ;;  %v211_v63 = vunpack.c.h.bf16 %v218_v47  ;;  %v105_v2 = vadd.f32 %v346_v7, %v84_v57  ;;  %v88_v3 = vmul.f32 %v207_v58, %v344_v1 }
  0x35   :  { %v120_v0 = vmul.f32 0.2, %v104_v56  ;;  %v89_v4 = vmul.f32 %v210_v59, %v344_v1  ;;  %v106_v5 = vadd.f32 %v346_v7, %v85_v60  ;;  %v107_v6 = vadd.f32 %v346_v7, %v86_v61 }
  0x36   :  { %v108_v8 = vadd.f32 %v346_v7, %v87_v62  ;;  %v90_v9 = vmul.f32 %v211_v63, %v344_v1  ;;  %v121_v11 = vmul.f32 0.2, %v105_v2  ;;  %v109_v12 = vadd.f32 %v346_v7, %v88_v3 }
  0x37   :  { %v136_v10 = vmax.f32 %v104_v56, %v120_v0  ;;  %v110_v13 = vadd.f32 %v346_v7, %v89_v4  ;;  %v122_v14 = vmul.f32 0.2, %v106_v5  ;;  %v123_v15 = vmul.f32 0.2, %v107_v6 }
  0x38   :  { %v124_v16 = vmul.f32 0.2, %v108_v8  ;;  %v111_v17 = vadd.f32 %v346_v7, %v90_v9  ;;  %v137_v18 = vmax.f32 %v105_v2, %v121_v11  ;;  %v125_v19 = vmul.f32 0.2, %v109_v12 }
  0x39   :  { %152 = vst [vmem:[#allocation7 + $0x40] sm:$0xff] %v136_v10  ;;  %v126_v20 = vmul.f32 0.2, %v110_v13  ;;  %v138_v21 = vmax.f32 %v106_v5, %v122_v14  ;;  %v139_v22 = vmax.f32 %v107_v6, %v123_v15 }
  0x3a   :  { %v140_v1 = vmax.f32 %v108_v8, %v124_v16  ;;  %v127_v23 = vmul.f32 0.2, %v111_v17  ;;  %153 = vst [vmem:[#allocation7 + $0x48] sm:$0xff] %v137_v18  ;;  %v141_v24 = vmax.f32 %v109_v12, %v125_v19 }
  0x3b   :  { %v142_v25 = vmax.f32 %v110_v13, %v126_v20  ;;  %154 = vst [vmem:[#allocation7 + $0x50] sm:$0xff] %v138_v21  ;;  %155 = vst [vmem:[#allocation7 + $0x58] sm:$0xff] %v139_v22 }
  0x3c   :  { %156 = vst [vmem:[#allocation7 + $0x60] sm:$0xff] %v140_v1  ;;  %v143_v26 = vmax.f32 %v111_v17, %v127_v23  ;;  %157 = vst [vmem:[#allocation7 + $0x68] sm:$0xff] %v141_v24 }
  0x3d   :  { %158 = vst [vmem:[#allocation7 + $0x70] sm:$0xff] %v142_v25 }
  0x3e   :  { %159 = vst [vmem:[#allocation7 + $0x78] sm:$0xff] %v143_v26 }
  0x3f   :  { %281 = shalt.err (!%p278_p6)
}
  0x40   :  { %s282_s10 = scalar_lea.hbm %s394_s2, 2048 }
  0x41   :  { %p283_p7 = scmp.ne.s32.totalorder %s394_s2, %s282_s10  ;;  %p286_p8 = scmp.lt.u32.totalorder %s282_s10, %s394_s2 }
  0x43   :  { %p288_p9 = pnand %p286_p8, %p283_p7 }
  0x45   :  { %291 = shalt.err (!%p288_p9)
}
  0x46   :  { %s303_s15 = smov 128   ;;  %s304_s16 = smov 8  }
  0x47   :  { %171 = dma.vmem_to_hbm [thread:$0]  %s166_s6, 2048, %s394_s2, [#allocation4], %s303_s15, %s303_s15, %s304_s16  }
  0x48   :  { %296 = dma.done.wait [#allocation4], 2048  }
  0x49   :  { %297 = vsyncadd [#allocation4], 4294965248 }
  0x4a   :  { %175 = vsyncpa [#allocation3], 1 }
  0x4b   :  { %176 = vsyncpa [#allocation6], 1 }
  0x4c   :  { %177 = vsyncpa [#allocation4], 1 }

// kernel: downblock_forward.2
= control target key start
LH: loop header
LB: loop body
LE: loop exit
PB: predicated region body
PF: predicated region fallthrough
CT: control target
= control target key end

     0   :  { %9 = vsyncpa [#allocation3], 0  ;;  %s850_s0 = inlined_call_operand.hbm [shape: bf16[128,128], index: 0, kind: input, shape index: {}]   ;;  %s851_s1 = inlined_call_operand.hbm [shape: bf16[128,128], index: 1, kind: input, shape index: {}]   ;;  %s852_s2 = inlined_call_operand.hbm [shape: bf16[128,128], index: 2, kind: output, shape index: {0}]   ;;  %s853_s3 = inlined_call_operand.hbm [shape: f32[8,128], index: 3, kind: output, shape index: {1}]  }
   0x1   :  { %10 = vsyncpa [#allocation6], 0 }
   0x2   :  { %11 = vsyncpa [#allocation4], 0 }
   0x3   :  { %12 = vsyncpa [#allocation9], 0  ;;  %s756_s12 = smov [#allocation2]   ;;  %s660_s16 = scalar_lea.hbm %s850_s0, 1024 }
   0x4   :  { %s22_s13 = sshll.u32 %s756_s12, 4  ;;  %p661_p0 = scmp.ne.s32.totalorder %s850_s0, %s660_s16  ;;  %s23_s13 = int_to_ptr.vmem [resolvable:$true] %s22_s13 }
   0x5   :  { %p664_p1 = scmp.lt.u32.totalorder %s660_s16, %s850_s0 }
   0x7   :  { %p666_p2 = pnand %p664_p1, %p661_p0 }
   0x9   :  { %669 = shalt.err (!%p666_p2)
}
   0xa   :  { %s670_s21 = scalar_lea.vmem %s23_s13, 1024  ;;  %p675_p4 = scmp.lt.s32.totalorder %s23_s13, %s23_s13 }
   0xb   :  { %p671_p3 = scmp.ne.s32.totalorder %s23_s13, %s670_s21  ;;  %p676_p5 = scmp.lt.s32.totalorder %s670_s21, %s670_s21 }
   0xd   :  { %p677_p6 = por %p676_p5, %p675_p4 }
   0xf   :  { %p678_p7 = pnand %p677_p6, %p671_p3 }
  0x11   :  { %681 = shalt.err (!%p678_p7)
}
  0x12   :  { %s757_s22 = smov 64   ;;  %s758_s23 = smov 4  }
  0x13   :  { %28 = dma.hbm_to_vmem [thread:$0]  %s850_s0, 1024, %s23_s13, [#allocation3], %s757_s22, %s757_s22, %s758_s23  }
  0x14   :  { %s759_s26 = smov [#allocation5]   ;;  %s682_s30 = scalar_lea.hbm %s851_s1, 1024 }
  0x15   :  { %s34_s27 = sshll.u32 %s759_s26, 4  ;;  %p683_p8 = scmp.ne.s32.totalorder %s851_s1, %s682_s30  ;;  %s35_s27 = int_to_ptr.vmem [resolvable:$true] %s34_s27 }
  0x16   :  { %p686_p9 = scmp.lt.u32.totalorder %s682_s30, %s851_s1 }
  0x18   :  { %p688_p10 = pnand %p686_p9, %p683_p8 }
  0x1a   :  { %691 = shalt.err (!%p688_p10)
}
  0x1b   :  { %s692_s8 = scalar_lea.vmem %s35_s27, 1024  ;;  %p697_p12 = scmp.lt.s32.totalorder %s35_s27, %s35_s27 }
  0x1c   :  { %p693_p11 = scmp.ne.s32.totalorder %s35_s27, %s692_s8  ;;  %p698_p13 = scmp.lt.s32.totalorder %s692_s8, %s692_s8 }
  0x1e   :  { %p699_p0 = por %p698_p13, %p697_p12 }
  0x20   :  { %p700_p1 = pnand %p699_p0, %p693_p11 }
  0x22   :  { %703 = shalt.err (!%p700_p1)
}
  0x23   :  { %40 = dma.hbm_to_vmem [thread:$0]  %s851_s1, 1024, %s35_s27, [#allocation6], %s757_s22, %s757_s22, %s758_s23  }
  0x24   :  { %748 = dma.done.wait [#allocation3], 1024  }
  0x25   :  { %749 = vsyncadd [#allocation3], 4294966272 }
  0x26   :  { %750 = dma.done.wait [#allocation6], 1024  }
  0x27   :  { %751 = vsyncadd [#allocation6], 4294966272  ;;  %v644_v0 = vld [vmem:[#allocation5] sm:$0xff]   ;;  %v645_v1 = vld [vmem:[#allocation5 + $0x8] sm:$0xff]   ;;  %v760_v16 = vmov 0.0   ;;  %s761_s1 = smov [#allocation7]  }
  0x28   :  { %589 = vmatprep.subr.bf16.mxu0 %v644_v0  ;;  %621 = vmatprep.subr.bf16.mxu1 %v644_v0  ;;  %v646_v2 = vld [vmem:[#allocation5 + $0x10] sm:$0xff]   ;;  %v647_v3 = vld [vmem:[#allocation5 + $0x18] sm:$0xff]   ;;  %v652_v4 = vld [vmem:[#allocation2] sm:$0xff]   ;;  %56 = vst [vmem:[#allocation8] sm:$0xff] %v760_v16  ;;  %s451_s10 = sshll.u32 %s761_s1, 4  ;;  %s452_s10 = int_to_ptr.vmem [resolvable:$true] %s451_s10 }
  0x29   :  { %590 = vmatpush3.bf16.msra.mxu0 %v644_v0  ;;  %629 = vmatpush3.bf16.msra.mxu1 %v644_v0  ;;  %v648_v5 = vld [vmem:[#allocation5 + $0x20] sm:$0xff]   ;;  %v649_v7 = vld [vmem:[#allocation5 + $0x28] sm:$0xff]   ;;  %v650_v8 = vld [vmem:[#allocation5 + $0x30] sm:$0xff]   ;;  %s704_s11 = scalar_lea.vmem %s452_s10, 1024  ;;  %p709_p3 = scmp.lt.s32.totalorder %s452_s10, %s452_s10 }
  0x2a   :  { %591 = vmatprep.subr.bf16.mxu0 %v645_v1  ;;  %622 = vmatprep.subr.bf16.mxu1 %v645_v1  ;;  %v656_v6 = vld [vmem:[#allocation2 + $0x20] sm:$0xff]   ;;  %v651_v9 = vld [vmem:[#allocation5 + $0x38] sm:$0xff]   ;;  %v653_v10 = vld [vmem:[#allocation2 + $0x8] sm:$0xff]   ;;  %p705_p2 = scmp.ne.s32.totalorder %s452_s10, %s704_s11  ;;  %p710_p4 = scmp.lt.s32.totalorder %s704_s11, %s704_s11 }
  0x2b   :  { %605 = vmatprep.mubr.bf16.mxu0 %v652_v4  ;;  %613 = vmatprep.mubr.bf16.mxu1 %v656_v6  ;;  %v657_v11 = vld [vmem:[#allocation2 + $0x28] sm:$0xff]   ;;  %v654_v12 = vld [vmem:[#allocation2 + $0x10] sm:$0xff]   ;;  %v655_v14 = vld [vmem:[#allocation2 + $0x18] sm:$0xff]  }
  0x2c   :  { %v658_v13 = vld [vmem:[#allocation2 + $0x30] sm:$0xff]   ;;  %v659_v15 = vld [vmem:[#allocation2 + $0x38] sm:$0xff]   ;;  %p711_p5 = por %p710_p4, %p709_p3 }
  0x2d   :  { %592 = vmatpush3.bf16.msra.mxu0 %v645_v1  ;;  %630 = vmatpush3.bf16.msra.mxu1 %v645_v1 }
  0x2e   :  { %593 = vmatprep.subr.bf16.mxu0 %v646_v2  ;;  %623 = vmatprep.subr.bf16.mxu1 %v646_v2  ;;  %p712_p6 = pnand %p711_p5, %p705_p2 }
  0x31   :  { %594 = vmatpush3.bf16.msra.mxu0 %v646_v2  ;;  %631 = vmatpush3.bf16.msra.mxu1 %v646_v2 }
  0x32   :  { %595 = vmatprep.subr.bf16.mxu0 %v647_v3  ;;  %624 = vmatprep.subr.bf16.mxu1 %v647_v3 }
  0x35   :  { %596 = vmatpush3.bf16.msra.mxu0 %v647_v3  ;;  %632 = vmatpush3.bf16.msra.mxu1 %v647_v3 }
  0x36   :  { %597 = vmatprep.subr.bf16.mxu0 %v648_v5  ;;  %625 = vmatprep.subr.bf16.mxu1 %v648_v5 }
  0x39   :  { %598 = vmatpush3.bf16.msra.mxu0 %v648_v5  ;;  %633 = vmatpush3.bf16.msra.mxu1 %v648_v5 }
  0x3a   :  { %599 = vmatprep.subr.bf16.mxu0 %v649_v7  ;;  %626 = vmatprep.subr.bf16.mxu1 %v649_v7 }
  0x3d   :  { %600 = vmatpush3.bf16.msra.mxu0 %v649_v7  ;;  %634 = vmatpush3.bf16.msra.mxu1 %v649_v7 }
  0x3e   :  { %601 = vmatprep.subr.bf16.mxu0 %v650_v8  ;;  %627 = vmatprep.subr.bf16.mxu1 %v650_v8 }
  0x41   :  { %602 = vmatpush3.bf16.msra.mxu0 %v650_v8  ;;  %635 = vmatpush3.bf16.msra.mxu1 %v650_v8 }
  0x42   :  { %603 = vmatprep.subr.bf16.mxu0 %v651_v9  ;;  %628 = vmatprep.subr.bf16.mxu1 %v651_v9 }
  0x45   :  { %604 = vmatpush3.bf16.msra.mxu0 %v651_v9  ;;  %636 = vmatpush3.bf16.msra.mxu1 %v651_v9 }
  0x48   :  { %606 = vmatmul.mubr.bf16.vlgmr.msra.gmra.mrb[0].mxu0 %v653_v10  ;;  %614 = vmatmul.mubr.bf16.vlgmr.msra.gmra.mrb[0].mxu1 %v657_v11 }
  0x49   :  { %609 = vmatprep.mubr.bf16.mxu0 %v654_v12  ;;  %617 = vmatprep.mubr.bf16.mxu1 %v658_v13 }
  0x50   :  { %610 = vmatmul.mubr.bf16.gmra.mrb[4].mxu0 %v655_v14  ;;  %618 = vmatmul.mubr.bf16.gmra.mrb[4].mxu1 %v659_v15 }
 0x11b   :  { %v607_v17 = vpop.f32.mrb[0].mxu0  ;;  %v615_v18 = vpop.f32.mrb[0].mxu1 }
 0x11c   :  { %v219_v19 = vpop.f32.mrb[1].mxu0  ;;  %v251_v20 = vpop.f32.mrb[1].mxu1 }
 0x11d   :  { %v608_v21 = vpop.f32.mrb[2].mxu0  ;;  %v616_v22 = vpop.f32.mrb[2].mxu1 }
 0x11e   :  { %v283_v23 = vpack.c.bf16 %v608_v21, %v607_v17  ;;  %v222_v24 = vpop.f32.mrb[3].mxu0  ;;  %v813_v25 = vpack.c.bf16 %v616_v22, %v615_v18  ;;  %v254_v26 = vpop.f32.mrb[3].mxu1 }
 0x11f   :  { %v282_v27 = vpack.c.bf16 %v222_v24, %v219_v19  ;;  %v815_v28 = vpack.c.bf16 %v254_v26, %v251_v20 }
 0x120   :  { %566 = vst [vmem:[#allocation7 + $0x8] sm:$0xff] %v283_v23   ;;  %570 = vst [vmem:[#allocation7 + $0x28] sm:$0xff] %v813_v25   ;;  %v364_v29 = vunpack.c.l.bf16 %v283_v23  ;;  %v365_v32 = vunpack.c.h.bf16 %v283_v23 }
 0x121   :  { %530 = vst [vmem:[#allocation7] sm:$0xff] %v282_v27   ;;  %v362_v30 = vunpack.c.l.bf16 %v282_v27  ;;  %v363_v31 = vunpack.c.h.bf16 %v282_v27  ;;  %569 = vst [vmem:[#allocation7 + $0x20] sm:$0xff] %v815_v28  }
 0x122   :  { %v405_v40 = vmul.f32 %v364_v29, %v364_v29  ;;  %v406_v45 = vmul.f32 %v365_v32, %v365_v32 }
 0x123   :  { %v379_v33 = vadd.f32 %v363_v31, %v362_v30  ;;  %v403_v34 = vmul.f32 %v362_v30, %v362_v30  ;;  %v404_v35 = vmul.f32 %v363_v31, %v363_v31  ;;  %v611_v36 = vpop.f32.mrb[4].mxu0  ;;  %v619_v37 = vpop.f32.mrb[4].mxu1 }
 0x124   :  { %v235_v38 = vpop.f32.mrb[5].mxu0  ;;  %v267_v39 = vpop.f32.mrb[5].mxu1 }
 0x125   :  { %v380_v41 = vadd.f32 %v379_v33, %v364_v29  ;;  %v419_v42 = vadd.f32 %v404_v35, %v403_v34  ;;  %v612_v43 = vpop.f32.mrb[6].mxu0  ;;  %v620_v44 = vpop.f32.mrb[6].mxu1 }
 0x126   :  { %v285_v46 = vpack.c.bf16 %v612_v43, %v611_v36  ;;  %v238_v47 = vpop.f32.mrb[7].mxu0  ;;  %v289_v48 = vpack.c.bf16 %v620_v44, %v619_v37  ;;  %v270_v49 = vpop.f32.mrb[7].mxu1 }
 0x127   :  { %v420_v50 = vadd.f32 %v419_v42, %v405_v40  ;;  %v284_v51 = vpack.c.bf16 %v238_v47, %v235_v38  ;;  %v381_v52 = vadd.f32 %v380_v41, %v365_v32  ;;  %v288_v53 = vpack.c.bf16 %v270_v49, %v267_v39 }
 0x128   :  { %568 = vst [vmem:[#allocation7 + $0x18] sm:$0xff] %v285_v46   ;;  %572 = vst [vmem:[#allocation7 + $0x38] sm:$0xff] %v289_v48  }
 0x129   :  { %567 = vst [vmem:[#allocation7 + $0x10] sm:$0xff] %v284_v51   ;;  %v366_v54 = vunpack.c.l.bf16 %v284_v51  ;;  %v367_v55 = vunpack.c.h.bf16 %v284_v51  ;;  %v421_v56 = vadd.f32 %v420_v50, %v406_v45  ;;  %571 = vst [vmem:[#allocation7 + $0x30] sm:$0xff] %v288_v53  }
 0x12a   :  { %715 = shalt.err (!%p712_p6)
}
 0x12b   :  { %s716_s14 = scalar_lea.hbm %s852_s2, 1024 }
 0x12c   :  { %p717_p7 = scmp.ne.s32.totalorder %s852_s2, %s716_s14  ;;  %p720_p8 = scmp.lt.u32.totalorder %s716_s14, %s852_s2 }
 0x12e   :  { %p722_p9 = pnand %p720_p8, %p717_p7 }
 0x130   :  { %725 = shalt.err (!%p722_p9)
}
 0x131   :  { %457 = dma.vmem_to_hbm [thread:$0]  %s452_s10, 1024, %s852_s2, [#allocation4], %s757_s22, %s757_s22, %s758_s23   ;;  %v368_v57 = vunpack.c.l.bf16 %v285_v46  ;;  %v382_v58 = vadd.f32 %v381_v52, %v366_v54  ;;  %v407_v59 = vmul.f32 %v366_v54, %v366_v54  ;;  %v369_v60 = vunpack.c.h.bf16 %v285_v46  ;;  %v402_v51 = vld [vmem:[#allocation8 + $0x1] sm:$0x1] }
 0x132   :  { %v408_v62 = vmul.f32 %v367_v55, %v367_v55  ;;  %v370_v3 = vunpack.c.l.bf16 %v815_v28  ;;  %v371_v6 = vunpack.c.h.bf16 %v815_v28  ;;  %v372_v8 = vunpack.c.l.bf16 %v813_v25  ;;  %s762_s2 = smov [#allocation8]  }
 0x133   :  { %v383_v61 = vadd.f32 %v382_v58, %v367_v55  ;;  %v422_v63 = vadd.f32 %v421_v56, %v407_v59  ;;  %v409_v0 = vmul.f32 %v368_v57, %v368_v57  ;;  %v410_v4 = vmul.f32 %v369_v60, %v369_v60  ;;  %s464_s21 = sshll.u32 %s762_s2, 4  ;;  %s465_s21 = int_to_ptr.vmem [resolvable:$true] %s464_s21 }
 0x134   :  { %v411_v10 = vmul.f32 %v370_v3, %v370_v3  ;;  %v373_v12 = vunpack.c.h.bf16 %v813_v25  ;;  %v412_v14 = vmul.f32 %v371_v6, %v371_v6  ;;  %v413_v16 = vmul.f32 %v372_v8, %v372_v8  ;;  %s726_s22 = scalar_lea.vmem %s465_s21, 128  ;;  %p731_p11 = scmp.lt.s32.totalorder %s465_s21, %s465_s21 }
 0x135   :  { %v384_v1 = vadd.f32 %v383_v61, %v368_v57  ;;  %v423_v2 = vadd.f32 %v422_v63, %v408_v62  ;;  %v374_v19 = vunpack.c.l.bf16 %v288_v53  ;;  %v375_v22 = vunpack.c.h.bf16 %v288_v53  ;;  %p727_p10 = scmp.ne.s32.totalorder %s465_s21, %s726_s22  ;;  %p732_p12 = scmp.lt.s32.totalorder %s726_s22, %s726_s22 }
 0x136   :  { %v414_v20 = vmul.f32 %v373_v12, %v373_v12  ;;  %v376_v24 = vunpack.c.l.bf16 %v289_v48  ;;  %v377_v29 = vunpack.c.h.bf16 %v289_v48  ;;  %v378_v48 = vld [vmem:[#allocation8] sm:$0x1] }
 0x137   :  { %v424_v5 = vadd.f32 %v423_v2, %v409_v0  ;;  %v385_v7 = vadd.f32 %v384_v1, %v369_v60  ;;  %v415_v27 = vmul.f32 %v374_v19, %v374_v19  ;;  %v416_v31 = vmul.f32 %v375_v22, %v375_v22  ;;  %p733_p13 = por %p732_p12, %p731_p11 }
 0x138   :  { %v417_v25 = vmul.f32 %v376_v24, %v376_v24  ;;  %v418_v35 = vmul.f32 %v377_v29, %v377_v29 }
 0x139   :  { %v386_v9 = vadd.f32 %v385_v7, %v370_v3  ;;  %v425_v11 = vadd.f32 %v424_v5, %v410_v4  ;;  %p734_p0 = pnand %p733_p13, %p727_p10 }
 0x13b   :  { %v387_v13 = vadd.f32 %v386_v9, %v371_v6  ;;  %v426_v15 = vadd.f32 %v425_v11, %v411_v10 }
 0x13d   :  { %v388_v17 = vadd.f32 %v387_v13, %v372_v8  ;;  %v427_v18 = vadd.f32 %v426_v15, %v412_v14 }
 0x13f   :  { %v428_v21 = vadd.f32 %v427_v18, %v413_v16  ;;  %v389_v23 = vadd.f32 %v388_v17, %v373_v12 }
 0x141   :  { %v390_v26 = vadd.f32 %v389_v23, %v374_v19  ;;  %v429_v28 = vadd.f32 %v428_v21, %v414_v20 }
 0x143   :  { %v391_v30 = vadd.f32 %v390_v26, %v375_v22  ;;  %v430_v32 = vadd.f32 %v429_v28, %v415_v27 }
 0x145   :  { %v392_v33 = vadd.f32 %v391_v30, %v376_v24  ;;  %v431_v34 = vadd.f32 %v430_v32, %v416_v31 }
 0x147   :  { %v393_v36 = vadd.f32 %v392_v33, %v377_v29  ;;  %v432_v37 = vadd.f32 %v431_v34, %v417_v25 }
 0x149   :  { %v394_v38 = vrot.slane %v393_v36, 4  ;;  %v433_v39 = vadd.f32 %v432_v37, %v418_v35 }
 0x14b   :  { %v395_v40 = vadd.f32 %v394_v38, %v393_v36  ;;  %v434_v41 = vrot.slane %v433_v39, 4 }
 0x14d   :  { %v396_v42 = vrot.slane %v395_v40, 2  ;;  %v435_v43 = vadd.f32 %v434_v41, %v433_v39 }
 0x14f   :  { %v397_v44 = vadd.f32 %v396_v42, %v395_v40  ;;  %v436_v45 = vrot.slane %v435_v43, 2 }
 0x151   :  { %v398_v46 = vrot.slane %v397_v44, 1  ;;  %v437_v47 = vadd.f32 %v436_v45, %v435_v43 }
 0x153   :  { %v399_v49 = vadd.f32 %v398_v46, %v397_v44  ;;  %v438_v50 = vrot.slane %v437_v47, 1 }
 0x155   :  { %v400_v52 = vadd.f32 %v399_v49, %v378_v48  ;;  %v439_v53 = vadd.f32 %v438_v50, %v437_v47 }
 0x157   :  { %401 = vst [vmem:[#allocation8] sm:$0x1] %v400_v52  ;;  %v440_v54 = vadd.f32 %v439_v53, %v402_v51 }
 0x159   :  { %441 = vst [vmem:[#allocation8 + $0x1] sm:$0x1] %v440_v54 }
 0x15a   :  { %737 = shalt.err (!%p734_p0)
}
 0x15b   :  { %s738_s25 = scalar_lea.hbm %s853_s3, 128 }
 0x15c   :  { %p739_p1 = scmp.ne.s32.totalorder %s853_s3, %s738_s25  ;;  %p742_p2 = scmp.lt.u32.totalorder %s738_s25, %s853_s3 }
 0x15e   :  { %p744_p3 = pnand %p742_p2, %p739_p1 }
 0x160   :  { %747 = shalt.err (!%p744_p3)
}
 0x161   :  { %467 = dma.vmem_to_hbm [thread:$0]  %s465_s21, 128, %s853_s3, [#allocation9]  }
 0x162   :  { %752 = dma.done.wait [#allocation4], 1024  }
 0x163   :  { %753 = vsyncadd [#allocation4], 4294966272 }
 0x164   :  { %754 = dma.done.wait [#allocation9], 128  }
 0x165   :  { %755 = vsyncadd [#allocation9], 4294967168 }
 0x166   :  { %474 = vsyncpa [#allocation3], 1 }
 0x167   :  { %475 = vsyncpa [#allocation6], 1 }
 0x168   :  { %476 = vsyncpa [#allocation4], 1 }
 0x169   :  { %477 = vsyncpa [#allocation9], 1 }

</bundles_post_ra>
